<compile_context>
chip_gen: v7x
topology: tpu7x:2x2x1
jax: 0.10.0
libtpu: 0.0.40
codegen_flags: <defaults>
</compile_context>

<pallas_src>
import functools

import jax
import jax.numpy as jnp
from jax.experimental import pallas as pl
from jax.experimental.pallas import tpu as pltpu

LN_EPS = 1e-5  # torch.nn.LayerNorm default


def _round_up(v, m):
    return ((v + m - 1) // m) * m


def _gelu_exact(x):
    # erf-based ("exact") GELU matching torch.nn.GELU() default.
    # erf via Abramowitz & Stegun 7.1.26 (exp-only -> EUP, max abs err ~1.5e-7).
    z = x * 0.7071067811865476
    s = jnp.where(z >= 0.0, 1.0, -1.0)
    a = jnp.abs(z)
    t = 1.0 / (1.0 + 0.3275911 * a)
    poly = t * (0.254829592 + t * (-0.284496736 + t * (1.421413741
               + t * (-1.453152027 + t * 1.061405429))))
    erf = s * (1.0 - poly * jnp.exp(-a * a))
    return 0.5 * x * (1.0 + erf)


def _convnext_kernel(msg_ref, scat_ref, x_ref, rowp_ref, w1_ref, b1_ref,
                     w2_ref, out_ref, acc_ref, *, f_true, eps):
    """Fused: edge-tiled scatter-add of precomputed messages + LN + MLP + residual."""
    k = pl.program_id(1)

    @pl.when(k == 0)
    def _():
        acc_ref[...] = jnp.zeros_like(acc_ref)

    # ---- scatter-add: one-hot is exact 0/1 (stored bf16, halves HBM/VMEM);
    # upcast and accumulate in f32 so we match the f32 reference to 1e-5.
    scat = scat_ref[...].astype(jnp.float32)                     # (TN, TE)
    acc_ref[...] += jnp.dot(scat, msg_ref[...],
                            preferred_element_type=jnp.float32)  # (TN, F_pad)

    # ---- finalize: LayerNorm -> Linear -> GELU -> Linear -> scale -> residual
    @pl.when(k == pl.num_programs(1) - 1)
    def _():
        rowp = rowp_ref[...]
        bk, ln_g, ln_b, b2, ls = (rowp[0:1], rowp[1:2], rowp[2:3],
                                  rowp[3:4], rowp[4:5])
        h = acc_ref[...] + bk
        f_pad = h.shape[-1]
        # LayerNorm over the TRUE feature width; padded lanes of h are 0 and
        # gamma/beta are zero-padded, so padded lanes contribute/receive 0.
        lane = jax.lax.broadcasted_iota(jnp.int32, (1, f_pad), 1)
        mask = lane < f_true
        inv_f = 1.0 / float(f_true)
        mu = jnp.sum(h, axis=-1, keepdims=True) * inv_f
        d = jnp.where(mask, h - mu, 0.0)
        var = jnp.sum(d * d, axis=-1, keepdims=True) * inv_f
        hn = d * jax.lax.rsqrt(var + eps) * ln_g + ln_b
        z = jnp.dot(hn, w1_ref[...],
                    preferred_element_type=jnp.float32) + b1_ref[...]
        z = _gelu_exact(z)
        y = jnp.dot(z, w2_ref[...],
                    preferred_element_type=jnp.float32) + b2
        out_ref[...] = ls * y + x_ref[...]


def convnext_forward(x, attr, edge_index, params, batch=None, *,
                     node_tile=256, edge_tile=512):
    """Fused ConvNext layer forward. `batch` is unused (aggr='add')."""
    del batch
    N, F = x.shape
    E, A = attr.shape
    H = params["w1"].shape[1]

    f32, bf16 = jnp.float32, jnp.bfloat16
    F_pad = _round_up(F, 128)
    H_pad = _round_up(H, 128)

    # ---- tile selection -------------------------------------------------
    # Node axis: >= 2 tiles whenever possible so the "parallel" axis can use
    # both v7x TensorCores; cap at node_tile for MXU-friendly heights.
    N8 = _round_up(max(N, 1), 8)
    if N8 <= 8:
        TN = N8
    else:
        TN = min(node_tile, max(8, _round_up((N + 1) // 2, 8)))
    E8 = _round_up(max(E, 1), 8)
    TE = E8 if E8 <= edge_tile else edge_tile      # tiled TE is a mult of 128

    # Generation-aware VMEM budget (v7x has only 64 MiB/TC).
    try:
        cap = int(pltpu.get_tpu_info().vmem_capacity_bytes)
    except Exception:
        cap = 64 << 20                             # most conservative (v7x)
    budget = int(cap * 0.75)

    def vmem_estimate(tn, te):
        # single-buffered constants (pl.Buffered(1)): W1, W2, rowp, b1
        const = (F_pad * H_pad + H_pad * F_pad + 8 * F_pad + 8 * H_pad) * 4
        # double-buffered streams: msg tile, scatter tile (bf16), x tile, out tile
        stream = 2 * (te * F_pad * 4 + tn * te * 2 + 2 * tn * F_pad * 4)
        scratch = tn * F_pad * 4                                   # accumulator
        # in-kernel temporaries: f32 scatter cast, h/d/hn/y, z
        temps = tn * te * 4 + 4 * tn * F_pad * 4 + 2 * tn * H_pad * 4
        return const + stream + scratch + temps

    # Shrink tiles (never raise the cap past physical) until we fit.
    while vmem_estimate(TN, TE) > budget:
        if TE > 128:
            TE = max(128, (TE // 2 // 128) * 128 or 128)
        elif TN > 8:
            TN = max(8, (TN // 2 // 8) * 8 or 8)
        else:
            break

    N_pad = _round_up(max(N, TN), TN)
    E_pad = _round_up(max(E, TE), TE)
    GN, GE = N_pad // TN, E_pad // TE

    # ---- glue (plain XLA): precompute per-edge messages once -------------
    src = edge_index[0].astype(jnp.int32)
    dst = edge_index[1].astype(jnp.int32)
    kw = attr.astype(f32) @ params["wk"].astype(f32)       # (E, F)  hoisted
    msg = kw * x.astype(f32)[src]                          # (E, F)  index gather
    msg_p = jnp.zeros((E_pad, F_pad), f32).at[:E, :F].set(msg)

    # Scatter one-hot (exact 0/1) in bf16. Padded edges map to node 0 but
    # carry zero messages, so they contribute nothing.
    dst_p = jnp.zeros((E_pad,), jnp.int32).at[:E].set(dst)
    scatter = jnp.transpose(jax.nn.one_hot(dst_p, N_pad, dtype=bf16))  # (N_pad, E_pad)

    xp = jnp.zeros((N_pad, F_pad), f32).at[:N, :F].set(x.astype(f32))

    # Packed (8, F_pad) row params: [bk, ln_gamma, ln_beta, b2, layer_scale, 0, 0, 0]
    rowp = jnp.zeros((8, F_pad), f32)
    rowp = rowp.at[0, :F].set(params["bk"].reshape(-1))
    rowp = rowp.at[1, :F].set(params["ln_g"].reshape(-1))
    rowp = rowp.at[2, :F].set(params["ln_b"].reshape(-1))
    rowp = rowp.at[3, :F].set(params["b2"].reshape(-1))
    rowp = rowp.at[4, :F].set(params["ls"].reshape(-1))

    w1 = jnp.zeros((F_pad, H_pad), f32).at[:F, :H].set(params["w1"])
    b1 = jnp.zeros((1, H_pad), f32).at[:, :H].set(params["b1"])
    w2 = jnp.zeros((H_pad, F_pad), f32).at[:H, :F].set(params["w2"])

    est = vmem_estimate(TN, TE)
    vmem_limit = None
    if est > (16 << 20):                      # only constrain when the default
        vmem_limit = int(min(est * 1.25, cap * 0.9))  # scoped budget won't do

    cost = pl.CostEstimate(
        flops=int(2 * N_pad * E_pad * F_pad + 4 * N_pad * F_pad * H_pad),
        transcendentals=int(N_pad * H_pad),
        bytes_accessed=int(GN * E_pad * F_pad * 4      # msg tiles (re-read per node tile)
                           + N_pad * E_pad * 2         # scatter one-hot (bf16, once)
                           + 3 * N_pad * F_pad * 4     # x, out, h-ish
                           + (2 * F_pad * H_pad + 8 * F_pad + H_pad) * 4),
    )

    single = pl.Buffered(1)   # constant-index operands: one VMEM buffer
    kernel = functools.partial(_convnext_kernel, f_true=F, eps=LN_EPS)

    out = pl.pallas_call(
        kernel,
        out_shape=jax.ShapeDtypeStruct((N_pad, F_pad), f32),
        grid=(GN, GE),                                  # (node tiles, edge reduction)
        in_specs=[
            pl.BlockSpec((TE, F_pad), lambda i, k: (k, 0)),        # messages
            pl.BlockSpec((TN, TE), lambda i, k: (i, k)),           # scatter one-hot (bf16)
            pl.BlockSpec((TN, F_pad), lambda i, k: (i, 0)),        # x residual tile
            pl.BlockSpec((8, F_pad), lambda i, k: (0, 0),
                         pipeline_mode=single),                    # packed row params
            pl.BlockSpec((F_pad, H_pad), lambda i, k: (0, 0),
                         pipeline_mode=single),                    # W1
            pl.BlockSpec((1, H_pad), lambda i, k: (0, 0),
                         pipeline_mode=single),                    # b1
            pl.BlockSpec((H_pad, F_pad), lambda i, k: (0, 0),
                         pipeline_mode=single),                    # W2
        ],
        out_specs=pl.BlockSpec((TN, F_pad), lambda i, k: (i, 0)),
        scratch_shapes=[pltpu.VMEM((TN, F_pad), jnp.float32)],
        compiler_params=pltpu.CompilerParams(
            dimension_semantics=("parallel", "arbitrary"),
            vmem_limit_bytes=vmem_limit),
        cost_estimate=cost,
    )(msg_p, scatter, xp, rowp, w1, b1, w2)

    return out[:N, :F]


def reference(x, attr, edge_index, params):
    """Pure-JAX reference mirroring the PyTorch forward pass."""
    src, dst = edge_index[0], edge_index[1]
    kw = attr @ params["wk"]
    msg = kw * x[src]
    h = jnp.zeros_like(x).at[dst].add(msg) + params["bk"]
    mu = h.mean(-1, keepdims=True)
    var = ((h - mu) ** 2).mean(-1, keepdims=True)
    hn = (h - mu) / jnp.sqrt(var + LN_EPS) * params["ln_g"] + params["ln_b"]
    z = jax.nn.gelu(hn @ params["w1"] + params["b1"], approximate=False)
    y = z @ params["w2"] + params["b2"]
    return params["ls"] * y + x


def init_params(key, feature_dim, attr_dim, layer_scale=1e-6):
    """Deterministic init mimicking PyTorch default Linear init shapes."""
    F, A, H = feature_dim, attr_dim, 4 * feature_dim
    ks = jax.random.split(key, 6)

    def uni(k, shape, fan_in):
        b = 1.0 / jnp.sqrt(fan_in)
        return jax.random.uniform(k, shape, jnp.float32, -b, b)

    return {
        "wk": uni(ks[0], (A, F), A),              # Conv kernel linear (attr -> per-channel weight)
        "bk": jnp.zeros((1, F), jnp.float32),     # Conv bias
        "ln_g": jnp.ones((1, F), jnp.float32),
        "ln_b": jnp.zeros((1, F), jnp.float32),
        "w1": uni(ks[1], (F, H), F),
        "b1": uni(ks[2], (1, H), F),
        "w2": uni(ks[3], (H, F), H),
        "b2": uni(ks[4], (1, F), H),
        "ls": jnp.full((1, F), layer_scale, jnp.float32),
    }


if __name__ == "__main__":
    N, F, A, E = 16, 32, 8, 48          # num_nodes, feature_dim, attr_dim, num_edges
    key = jax.random.PRNGKey(0)
    k_x, k_attr, k_src, k_dst, k_p = jax.random.split(key, 5)

    x = jax.random.normal(k_x, (N, F), jnp.float32)
    attr = jax.random.normal(k_attr, (E, A), jnp.float32)
    src = jax.random.randint(k_src, (E,), 0, N, jnp.int32)
    dst = jax.random.randint(k_dst, (E,), 0, N, jnp.int32)
    edge_index = jnp.stack([src, dst], axis=0)           # (2, E)
    batch = jnp.repeat(jnp.arange(2, dtype=jnp.int32), N // 2)  # unused (aggr='add')

    params = init_params(k_p, F, A)

    out = convnext_forward(x, attr, edge_index, params, batch)
    out = jax.block_until_ready(out)

    ref = reference(x, attr, edge_index, params)
    assert out.shape == (N, F) and out.dtype == jnp.float32
    assert jnp.allclose(out, ref, atol=1e-5, rtol=1e-5), "mismatch vs reference"

    print("KERNEL_OK")
</pallas_src>

<mosaic_0001>
module attributes {stable_mosaic.version = 11 : i64} {
  func.func @_convnext_kernel(%arg0: i32, %arg1: i32, %arg2: memref<48x128xf32, #tpu.memory_space<vmem>>, %arg3: memref<8x48xbf16, #tpu.memory_space<vmem>>, %arg4: memref<8x128xf32, #tpu.memory_space<vmem>>, %arg5: memref<8x128xf32, #tpu.memory_space<vmem>>, %arg6: memref<128x128xf32, #tpu.memory_space<vmem>>, %arg7: memref<1x128xf32, #tpu.memory_space<vmem>>, %arg8: memref<128x128xf32, #tpu.memory_space<vmem>>, %arg9: memref<8x128xf32, #tpu.memory_space<vmem>>, %arg10: memref<8x128xf32, #tpu.memory_space<vmem>>) attributes {dimension_semantics = [#tpu.dimension_semantics<parallel>, #tpu.dimension_semantics<arbitrary>], iteration_bounds = array<i64: 2, 1>, scalar_prefetch = 0 : i64, scratch_operands = 1 : i64, tpu.core_type = #tpu.core_type<tc>, window_params = [{transform_indices = @transform_0, window_bounds = array<i64: 48, 128>}, {transform_indices = @transform_1, window_bounds = array<i64: 8, 48>}, {transform_indices = @transform_2, window_bounds = array<i64: 8, 128>}, {pipeline_mode = #tpu.pipeline_mode<synchronous>, transform_indices = @transform_3, window_bounds = array<i64: 8, 128>}, {pipeline_mode = #tpu.pipeline_mode<synchronous>, transform_indices = @transform_4, window_bounds = array<i64: 128, 128>}, {pipeline_mode = #tpu.pipeline_mode<synchronous>, transform_indices = @transform_5, window_bounds = array<i64: 1, 128>}, {pipeline_mode = #tpu.pipeline_mode<synchronous>, transform_indices = @transform_6, window_bounds = array<i64: 128, 128>}, {transform_indices = @transform_7, window_bounds = array<i64: 8, 128>}]} {
    %c0_i32 = arith.constant 0 : i32
    %0 = arith.cmpi eq, %arg1, %c0_i32 : i32
    %1 = arith.extui %0 : i1 to i32
    %c0_i32_0 = arith.constant 0 : i32
    %2 = arith.cmpi ne, %1, %c0_i32_0 : i32
    scf.if %2 {
      %cst_10 = arith.constant 0.000000e+00 : f32
      %13 = vector.broadcast %cst_10 : f32 to vector<8x128xf32>
      %c0_11 = arith.constant 0 : index
      %c0_12 = arith.constant 0 : index
      %14 = vector.load %arg10[%c0_11, %c0_12] : memref<8x128xf32, #tpu.memory_space<vmem>>, vector<8x128xf32>
      tpu.vector_store %arg10[%c0_11, %c0_12], %13 {strides = array<i32>} : memref<8x128xf32, #tpu.memory_space<vmem>>, vector<8x128xf32>,
    } else {
    }
    %c0 = arith.constant 0 : index
    %c0_1 = arith.constant 0 : index
    %3 = vector.load %arg3[%c0, %c0_1] : memref<8x48xbf16, #tpu.memory_space<vmem>>, vector<8x48xbf16>
    %4 = arith.extf %3 : vector<8x48xbf16> to vector<8x48xf32>
    %c0_2 = arith.constant 0 : index
    %c0_3 = arith.constant 0 : index
    %5 = vector.load %arg10[%c0_2, %c0_3] : memref<8x128xf32, #tpu.memory_space<vmem>>, vector<8x128xf32>
    %c0_4 = arith.constant 0 : index
    %c0_5 = arith.constant 0 : index
    %6 = vector.load %arg2[%c0_4, %c0_5] : memref<48x128xf32, #tpu.memory_space<vmem>>, vector<48x128xf32>
    %cst = arith.constant dense<0.000000e+00> : vector<8x128xf32>
    %7 = tpu.matmul %4, %6, %cst {dimension_numbers = #tpu.dot_dimension_numbers<[1], [0], [0], [1], [0, 0, 1, 1], [], []>} : vector<8x48xf32>, vector<48x128xf32>, vector<8x128xf32> -> vector<8x128xf32>
    %8 = arith.addf %5, %7 : vector<8x128xf32>
    %c0_6 = arith.constant 0 : index
    %c0_7 = arith.constant 0 : index
    %9 = vector.load %arg10[%c0_6, %c0_7] : memref<8x128xf32, #tpu.memory_space<vmem>>, vector<8x128xf32>
    tpu.vector_store %arg10[%c0_6, %c0_7], %8 {strides = array<i32>} : memref<8x128xf32, #tpu.memory_space<vmem>>, vector<8x128xf32>,
    %c0_i32_8 = arith.constant 0 : i32
    %10 = arith.cmpi eq, %arg1, %c0_i32_8 : i32
    %11 = arith.extui %10 : i1 to i32
    %c0_i32_9 = arith.constant 0 : i32
    %12 = arith.cmpi ne, %11, %c0_i32_9 : i32
    scf.if %12 {
      %c0_10 = arith.constant 0 : index
      %c0_11 = arith.constant 0 : index
      %13 = vector.load %arg5[%c0_10, %c0_11] : memref<8x128xf32, #tpu.memory_space<vmem>>, vector<8x128xf32>
      %14 = vector.extract_strided_slice %13 {offsets = [0, 0], sizes = [1, 128], strides = [1, 1]} : vector<8x128xf32> to vector<1x128xf32>
      %15 = vector.extract_strided_slice %13 {offsets = [1, 0], sizes = [1, 128], strides = [1, 1]} : vector<8x128xf32> to vector<1x128xf32>
      %16 = vector.extract_strided_slice %13 {offsets = [2, 0], sizes = [1, 128], strides = [1, 1]} : vector<8x128xf32> to vector<1x128xf32>
      %17 = vector.extract_strided_slice %13 {offsets = [3, 0], sizes = [1, 128], strides = [1, 1]} : vector<8x128xf32> to vector<1x128xf32>
      %18 = vector.extract_strided_slice %13 {offsets = [4, 0], sizes = [1, 128], strides = [1, 1]} : vector<8x128xf32> to vector<1x128xf32>
      %c0_12 = arith.constant 0 : index
      %c0_13 = arith.constant 0 : index
      %19 = vector.load %arg10[%c0_12, %c0_13] : memref<8x128xf32, #tpu.memory_space<vmem>>, vector<8x128xf32>
      %20 = vector.broadcast %14 : vector<1x128xf32> to vector<8x128xf32>
      %21 = arith.addf %19, %20 : vector<8x128xf32>
      %22 = tpu.iota {dimensions = array<i32: 1>} : vector<1x128xi32>
      %c32_i32 = arith.constant 32 : i32
      %23 = vector.broadcast %c32_i32 : i32 to vector<1x128xi32>
      %24 = arith.cmpi slt, %22, %23 : vector<1x128xi32>
      %cst_14 = arith.constant dense<0.000000e+00> : vector<8xf32>
      %25 = vector.multi_reduction <add>, %21, %cst_14 [1] : vector<8x128xf32> to vector<8xf32>
      %26 = vector.shape_cast %25 : vector<8xf32> to vector<8x1xf32>
      %cst_15 = arith.constant 3.125000e-02 : f32
      %27 = vector.broadcast %cst_15 : f32 to vector<8x1xf32>
      %28 = arith.mulf %26, %27 : vector<8x1xf32>
      %29 = vector.broadcast %28 : vector<8x1xf32> to vector<8x128xf32>
      %30 = arith.subf %21, %29 : vector<8x128xf32>
      %cst_16 = arith.constant 0.000000e+00 : f32
      %31 = vector.shape_cast %24 : vector<1x128xi1> to vector<1x128xi1>
      %32 = vector.broadcast %31 : vector<1x128xi1> to vector<8x128xi1>
      %33 = vector.broadcast %cst_16 : f32 to vector<8x128xf32>
      %34 = arith.select %32, %30, %33 : vector<8x128xi1>, vector<8x128xf32>
      %35 = arith.mulf %34, %34 : vector<8x128xf32>
      %cst_17 = arith.constant dense<0.000000e+00> : vector<8xf32>
      %36 = vector.multi_reduction <add>, %35, %cst_17 [1] : vector<8x128xf32> to vector<8xf32>
      %37 = vector.shape_cast %36 : vector<8xf32> to vector<8x1xf32>
      %cst_18 = arith.constant 3.125000e-02 : f32
      %38 = vector.broadcast %cst_18 : f32 to vector<8x1xf32>
      %39 = arith.mulf %37, %38 : vector<8x1xf32>
      %cst_19 = arith.constant 9.99999974E-6 : f32
      %40 = vector.broadcast %cst_19 : f32 to vector<8x1xf32>
      %41 = arith.addf %39, %40 : vector<8x1xf32>
      %42 = math.rsqrt %41 : vector<8x1xf32>
      %43 = vector.broadcast %42 : vector<8x1xf32> to vector<8x128xf32>
      %44 = arith.mulf %34, %43 : vector<8x128xf32>
      %45 = vector.broadcast %15 : vector<1x128xf32> to vector<8x128xf32>
      %46 = arith.mulf %44, %45 : vector<8x128xf32>
      %47 = vector.broadcast %16 : vector<1x128xf32> to vector<8x128xf32>
      %48 = arith.addf %46, %47 : vector<8x128xf32>
      %c0_20 = arith.constant 0 : index
      %c0_21 = arith.constant 0 : index
      %49 = vector.load %arg6[%c0_20, %c0_21] : memref<128x128xf32, #tpu.memory_space<vmem>>, vector<128x128xf32>
      %cst_22 = arith.constant dense<0.000000e+00> : vector<8x128xf32>
      %50 = tpu.matmul %48, %49, %cst_22 {dimension_numbers = #tpu.dot_dimension_numbers<[1], [0], [0], [1], [0, 0, 1, 1], [], []>} : vector<8x128xf32>, vector<128x128xf32>, vector<8x128xf32> -> vector<8x128xf32>
      %c0_23 = arith.constant 0 : index
      %c0_24 = arith.constant 0 : index
      %51 = vector.load %arg7[%c0_23, %c0_24] : memref<1x128xf32, #tpu.memory_space<vmem>>, vector<1x128xf32>
      %52 = vector.broadcast %51 : vector<1x128xf32> to vector<8x128xf32>
      %53 = arith.addf %50, %52 : vector<8x128xf32>
      %cst_25 = arith.constant 0.707106769 : f32
      %54 = vector.broadcast %cst_25 : f32 to vector<8x128xf32>
      %55 = arith.mulf %53, %54 : vector<8x128xf32>
      %cst_26 = arith.constant 0.000000e+00 : f32
      %56 = vector.broadcast %cst_26 : f32 to vector<8x128xf32>
      %57 = arith.cmpf oge, %55, %56 : vector<8x128xf32>
      %cst_27 = arith.constant 1.000000e+00 : f32
      %cst_28 = arith.constant -1.000000e+00 : f32
      %58 = vector.broadcast %cst_27 : f32 to vector<8x128xf32>
      %59 = vector.broadcast %cst_28 : f32 to vector<8x128xf32>
      %60 = arith.select %57, %58, %59 : vector<8x128xi1>, vector<8x128xf32>
      %61 = math.absf %55 : vector<8x128xf32>
      %cst_29 = arith.constant 0.327591091 : f32
      %62 = vector.broadcast %cst_29 : f32 to vector<8x128xf32>
      %63 = arith.mulf %62, %61 : vector<8x128xf32>
      %cst_30 = arith.constant 1.000000e+00 : f32
      %64 = vector.broadcast %cst_30 : f32 to vector<8x128xf32>
      %65 = arith.addf %64, %63 : vector<8x128xf32>
      %cst_31 = arith.constant 1.000000e+00 : f32
      %66 = vector.broadcast %cst_31 : f32 to vector<8x128xf32>
      %67 = arith.divf %66, %65 : vector<8x128xf32>
      %cst_32 = arith.constant 1.06140542 : f32
      %68 = vector.broadcast %cst_32 : f32 to vector<8x128xf32>
      %69 = arith.mulf %67, %68 : vector<8x128xf32>
      %cst_33 = arith.constant -1.45315206 : f32
      %70 = vector.broadcast %cst_33 : f32 to vector<8x128xf32>
      %71 = arith.addf %70, %69 : vector<8x128xf32>
      %72 = arith.mulf %67, %71 : vector<8x128xf32>
      %cst_34 = arith.constant 1.42141378 : f32
      %73 = vector.broadcast %cst_34 : f32 to vector<8x128xf32>
      %74 = arith.addf %73, %72 : vector<8x128xf32>
      %75 = arith.mulf %67, %74 : vector<8x128xf32>
      %cst_35 = arith.constant -0.284496725 : f32
      %76 = vector.broadcast %cst_35 : f32 to vector<8x128xf32>
      %77 = arith.addf %76, %75 : vector<8x128xf32>
      %78 = arith.mulf %67, %77 : vector<8x128xf32>
      %cst_36 = arith.constant 0.254829586 : f32
      %79 = vector.broadcast %cst_36 : f32 to vector<8x128xf32>
      %80 = arith.addf %79, %78 : vector<8x128xf32>
      %81 = arith.mulf %67, %80 : vector<8x128xf32>
      %cst_37 = arith.constant 0.000000e+00 : f32
      %82 = vector.broadcast %cst_37 : f32 to vector<8x128xf32>
      %83 = arith.subf %82, %61 : vector<8x128xf32>
      %84 = arith.mulf %83, %61 : vector<8x128xf32>
      %85 = math.exp %84 : vector<8x128xf32>
      %86 = arith.mulf %81, %85 : vector<8x128xf32>
      %cst_38 = arith.constant 1.000000e+00 : f32
      %87 = vector.broadcast %cst_38 : f32 to vector<8x128xf32>
      %88 = arith.subf %87, %86 : vector<8x128xf32>
      %89 = arith.mulf %60, %88 : vector<8x128xf32>
      %cst_39 = arith.constant 5.000000e-01 : f32
      %90 = vector.broadcast %cst_39 : f32 to vector<8x128xf32>
      %91 = arith.mulf %90, %53 : vector<8x128xf32>
      %cst_40 = arith.constant 1.000000e+00 : f32
      %92 = vector.broadcast %cst_40 : f32 to vector<8x128xf32>
      %93 = arith.addf %92, %89 : vector<8x128xf32>
      %94 = arith.mulf %91, %93 : vector<8x128xf32>
      %c0_41 = arith.constant 0 : index
      %c0_42 = arith.constant 0 : index
      %95 = vector.load %arg8[%c0_41, %c0_42] : memref<128x128xf32, #tpu.memory_space<vmem>>, vector<128x128xf32>
      %cst_43 = arith.constant dense<0.000000e+00> : vector<8x128xf32>
      %96 = tpu.matmul %94, %95, %cst_43 {dimension_numbers = #tpu.dot_dimension_numbers<[1], [0], [0], [1], [0, 0, 1, 1], [], []>} : vector<8x128xf32>, vector<128x128xf32>, vector<8x128xf32> -> vector<8x128xf32>
      %97 = vector.broadcast %17 : vector<1x128xf32> to vector<8x128xf32>
      %98 = arith.addf %96, %97 : vector<8x128xf32>
      %99 = vector.broadcast %18 : vector<1x128xf32> to vector<8x128xf32>
      %100 = arith.mulf %99, %98 : vector<8x128xf32>
      %c0_44 = arith.constant 0 : index
      %c0_45 = arith.constant 0 : index
      %101 = vector.load %arg4[%c0_44, %c0_45] : memref<8x128xf32, #tpu.memory_space<vmem>>, vector<8x128xf32>
      %102 = arith.addf %100, %101 : vector<8x128xf32>
      %c0_46 = arith.constant 0 : index
      %c0_47 = arith.constant 0 : index
      %103 = vector.load %arg9[%c0_46, %c0_47] : memref<8x128xf32, #tpu.memory_space<vmem>>, vector<8x128xf32>
      tpu.vector_store %arg9[%c0_46, %c0_47], %102 {strides = array<i32>} : memref<8x128xf32, #tpu.memory_space<vmem>>, vector<8x128xf32>,
    } else {
    }
    return
  }
  func.func @transform_0(%arg0: i32, %arg1: i32) -> (i32, i32) {
    %c0_i32 = arith.constant 0 : i32
    %c0_i32_0 = arith.constant 0 : i32
    return %arg1, %c0_i32 : i32, i32
  }
  func.func @transform_1(%arg0: i32, %arg1: i32) -> (i32, i32) {
    %c0_i32 = arith.constant 0 : i32
    return %arg0, %arg1 : i32, i32
  }
  func.func @transform_2(%arg0: i32, %arg1: i32) -> (i32, i32) {
    %c0_i32 = arith.constant 0 : i32
    %c0_i32_0 = arith.constant 0 : i32
    return %arg0, %c0_i32 : i32, i32
  }
  func.func @transform_3(%arg0: i32, %arg1: i32) -> (i32, i32) {
    %c0_i32 = arith.constant 0 : i32
    %c0_i32_0 = arith.constant 0 : i32
    %c0_i32_1 = arith.constant 0 : i32
    return %c0_i32, %c0_i32_0 : i32, i32
  }
  func.func @transform_4(%arg0: i32, %arg1: i32) -> (i32, i32) {
    %c0_i32 = arith.constant 0 : i32
    %c0_i32_0 = arith.constant 0 : i32
    %c0_i32_1 = arith.constant 0 : i32
    return %c0_i32, %c0_i32_0 : i32, i32
  }
  func.func @transform_5(%arg0: i32, %arg1: i32) -> (i32, i32) {
    %c0_i32 = arith.constant 0 : i32
    %c0_i32_0 = arith.constant 0 : i32
    %c0_i32_1 = arith.constant 0 : i32
    return %c0_i32, %c0_i32_0 : i32, i32
  }
  func.func @transform_6(%arg0: i32, %arg1: i32) -> (i32, i32) {
    %c0_i32 = arith.constant 0 : i32
    %c0_i32_0 = arith.constant 0 : i32
    %c0_i32_1 = arith.constant 0 : i32
    return %c0_i32, %c0_i32_0 : i32, i32
  }
  func.func @transform_7(%arg0: i32, %arg1: i32) -> (i32, i32) {
    %c0_i32 = arith.constant 0 : i32
    %c0_i32_0 = arith.constant 0 : i32
    return %arg0, %c0_i32 : i32, i32
  }
}

</mosaic_0001>

<bundles_post_ra>
// kernel: tpu_custom_call.1
= control target key start
LH: loop header
LB: loop body
LE: loop exit
PB: predicated region body
PF: predicated region fallthrough
CT: control target
= control target key end

     0   :  { %s1835_s0 = inlined_call_operand.hbm [shape: f32[48,128], index: 0, kind: input, shape index: {}]   ;;  %s1836_s1 = inlined_call_operand.hbm [shape: bf16[16,48], index: 1, kind: input, shape index: {}]   ;;  %s1837_s2 = inlined_call_operand.hbm [shape: f32[16,128], index: 2, kind: input, shape index: {}]   ;;  %s1838_s3 = inlined_call_operand.vmem [shape: f32[8,128], index: 3, kind: input, shape index: {}]   ;;  %s1839_s4 = inlined_call_operand.hbm [shape: f32[128,128], index: 4, kind: input, shape index: {}]   ;;  %s1840_s5 = inlined_call_operand.vmem [shape: f32[1,128], index: 5, kind: input, shape index: {}]   ;;  %s1841_s6 = inlined_call_operand.hbm [shape: f32[128,128], index: 6, kind: input, shape index: {}]   ;;  %s1842_s7 = inlined_call_operand.hbm [shape: f32[16,128], index: 7, kind: output, shape index: {}]  }
   0x1   :  { %1861 = sst [smem:[#allocation22_spill]] %s1836_s1 }
   0x2   :  { %1862 = sst [smem:[#allocation23_spill]] %s1839_s4 }
   0x3   :  { %1863 = sst [smem:[#allocation24_spill]] %s1842_s7 }
   0x4   :  { %12 = vsyncpa [#allocation4], 0 }
   0x5   :  { %13 = vsyncpa [#allocation7], 0 }
   0x6   :  { %15 = vsyncpa [#allocation7 + $0x1], 0 }
   0x7   :  { %16 = vsyncpa [#allocation10], 0 }
   0x8   :  { %17 = vsyncpa [#allocation5], 0 }
   0x9   :  { %19 = vsyncpa [#allocation5 + $0x1], 0  ;;  %s1492_s24 = smov 0   ;;  %s1494_s25 = smov 0  }
   0xa   :  { %s1496_s26 = smov 0   ;;  %s1498_s27 = smov 0  }
   0xb   :  { %s1500_s28 = smov 0   ;;  %s1502_s29 = smov 0  }
   0xc LB: > { %1864 = sst [smem:[#allocation17_spill]] %s1418_s24  ;;  %s1523_s30 = sadd.s32 4294967295, %s1438_s29   ;;  %s1438_s29 = sphi %s1502_s29, %s25_s29   ;;  %s1434_s28 = sphi %s1500_s28, %s1904_s28   ;;  %s1430_s27 = sphi %s1498_s27, %s1903_s27   ;;  %s1426_s26 = sphi %s1496_s26, %s1899_s26   ;;  %s1422_s25 = sphi %s1494_s25, %s1902_s25   ;;  %s1418_s24 = sphi %s1492_s24, %s1901_s24  }
   0xd   : > { %1865 = sst [smem:[#allocation18_spill]] %s1426_s26  ;;  %s888_s8 = sadd.s32 4294967294, %s1438_s29  }
   0xe   : > { %p85_p0 = scmp.ne.s32.totalorder %s1422_s25, %s1418_s24  ;;  %p1843_p1 = scmp.eq.s32.totalorder %s1523_s30, 0 }
   0xf   : > { %p225_p3 = scmp.eq.s32.totalorder %s888_s8, 1  ;;  %p889_p5 = scmp.ge.s32.totalorder %s1438_s29, 1 }
  0x10   : > { %p1532_p4 = por %p1843_p1, %p85_p0  ;;  %p232_p7 = scmp.lt.s32.totalorder %s1438_s29, 3 }
  0x11   : > { %p1537_p6 = por %p225_p3, %p85_p0  ;;  %s1440_s12 = smov [#allocation9]  }
  0x12   : > { %s1866_s9 = scalar_select %p1532_p4, 1, 0 }
  0x13   : > { %s1867_s10 = scalar_select %p1537_p6, 1, 0 }
  0x14   : > { %p1542_p8 = pnand %p889_p5, %p232_p7  ;;  %s263_s13 = sshll.u32 %s1440_s12, 4  ;;  %s264_s13 = int_to_ptr.vmem [resolvable:$true] %s263_s13 }
  0x15   : > { %1868 = sst [smem:[#allocation19_spill]] %s1867_s10  ;;  %s37_s15 = sadd.s32 1, %s1434_s28 }
  0x16   : > { %s1869_s11 = scalar_select %p1542_p8, 1, 0 }
  0x17   : > { %p1112_p10 = pneg %p1542_p8  ;;  %s1871_s4 = sld [smem:[#allocation23_spill]] }
  0x19   : > { %p1551_p11 = pnand %p1112_p10, %p1843_p1 }
  0x1b   : > { %s1870_s14 = scalar_select %p1551_p11, 1, 0 }
  0x1c   : > { %p1564_p13 = pneg %p1551_p11 }
  0x1d   : > { %s1204_s18 = scalar_lea.hbm %s1871_s4, 2048 }
  0x1e   : > { %p1205_p12 = scmp.ne.s32.totalorder %s1871_s4, %s1204_s18  ;;  %p1211_p5 = scmp.lt.u32.totalorder %s1204_s18, %s1871_s4 }
  0x20   : > { %p1207_p0 = pnand %p1564_p13, %p1205_p12 }
  0x22   : > { %p1208_p3 = pneg %p1207_p0 }
  0x24   : > { %p1213_p7 = pnand %p1211_p5, %p1208_p3 }
  0x26   : > { %1216 = shalt.err (!%p1213_p7)
}
  0x27   : > { %s1217_s8 = scalar_lea.vmem %s264_s13, 2048  ;;  %p1225_p2 = scmp.lt.s32.totalorder %s264_s13, %s264_s13 }
  0x28   : > { %p1218_p10 = scmp.ne.s32.totalorder %s264_s13, %s1217_s8  ;;  %p1226_p6 = scmp.lt.s32.totalorder %s1217_s8, %s1217_s8 }
  0x2a   : > { %p1220_p9 = pnand %p1218_p10, %p1564_p13  ;;  %p1227_p4 = por %p1226_p6, %p1225_p2 }
  0x2c   : > { %p1221_p1 = pneg %p1220_p9 }
  0x2e   : > { %p1228_p8 = pnand %p1227_p4, %p1221_p1 }
  0x30   : > { %1231 = shalt.err (!%p1228_p8)
}
  0x31   : > { %s1846_s12 = smov 128   ;;  %s1848_s16 = smov 8  }
  0x32   : > { %1118 = dma.hbm_to_vmem [thread:$0]  (!%p1551_p11), %s1871_s4, 2048, %s264_s13, [#allocation10], %s1846_s12, %s1846_s12, %s1848_s16  }
  0x33   : > { %p39_p1 = scmp.ge.s32.totalorder %s37_s15, 2  ;;  %s72_s19 = sadd.s32 1, %s1426_s26 }
  0x34   : > { %p79_p2 = scmp.ne.s32.totalorder %s1426_s26, %s1422_s25  ;;  %p80_p4 = scmp.eq.s32.totalorder %s1438_s29, 0 }
  0x35   : > { %s1906_s15 = smov (%p39_p1, %s37_s15), 0  ;;  %p1875_p8 = scmp.eq.s32.totalorder %s1523_s30, 1 }
  0x36   : > { %1873 = sst [smem:[#allocation20_spill]] %s1906_s15  ;;  %p1589_p6 = por %p80_p4, %p79_p2 }
  0x37   : > { %p1595_p9 = por %p1875_p8, %p79_p2  ;;  %s67_s23 = ssub.s32 %s1434_s28, %s1906_s15 }
  0x38   : > { %p1136_p12 = scmp.lt.s32.totalorder %s1438_s29, 2  ;;  %p70_p0 = scmp.eq.s32.totalorder %s67_s23, 0 }
  0x39   : > { %s1876_s22 = scalar_select %p1595_p9, 1, 0 }
  0x3a   : > { %s293_s13 = sand.u32 1, %s1438_s29   ;;  %s295_s8 = sand.u32 1, %s1426_s26  }
  0x3b   : > { %s1605_s17 = scalar_select %p70_p0, %s1426_s26, %s72_s19  }
  0x3c   : > { %s894_s18 = sshll.u32 %s295_s8, 2  ;;  %s895_s12 = sshll.u32 %s1434_s28, 6 }
  0x3d   : > { %1877 = sst [smem:[#allocation21_spill]] %s1605_s17  ;;  %s1878_s1 = sld [smem:[#allocation22_spill]] }
  0x3e   : > { %s297_s24 = scalar_lea.vmem [#allocation6], %s894_s18  ;;  %p1615_p3 = pnand %p1136_p12, %p1589_p6 }
  0x3f   : > { %s305_s7 = sshll.u32 %s297_s24, 4  ;;  %s1621_s19 = sshll.u32 %s295_s8, 3  ;;  %s1619_s7 = int_to_ptr.vmem [resolvable:$true] %s305_s7 }
  0x40   : > { %s1879_s23 = scalar_select %p1615_p3, 1, 0 }
  0x41   : > { %s1623_s4 = scalar_lea.sflag [#allocation7], %s293_s13  ;;  %p1858_p7 = pneg %p1615_p3 }
  0x43   : > { %s1611_s10 = scalar_lea.hbm %s1878_s1, %s895_s12  ;;  %s1237_s20 = scalar_lea.hbm %s1878_s1, 128 }
  0x44   : > { %s1232_s12 = scalar_lea.hbm %s1611_s10, 64  ;;  %p1238_p2 = scmp.lt.u32.totalorder %s1611_s10, %s1878_s1 }
  0x45   : > { %p1233_p5 = scmp.ne.s32.totalorder %s1611_s10, %s1232_s12  ;;  %p1239_p4 = scmp.lt.u32.totalorder %s1237_s20, %s1232_s12 }
  0x46   : > { %p1241_p8 = scmp.lt.u32.totalorder %s1232_s12, %s1611_s10 }
  0x47   : > { %p1235_p10 = pnand %p1858_p7, %p1233_p5  ;;  %p1240_p6 = por %p1239_p4, %p1238_p2 }
  0x49   : > { %p1236_p1 = pneg %p1235_p10  ;;  %p1242_p12 = por %p1241_p8, %p1240_p6 }
  0x4b   : > { %p1243_p0 = pnand %p1242_p12, %p1236_p1 }
  0x4d   : > { %1246 = shalt.err (!%p1243_p0)
}
  0x4e   : > { %s1247_s13 = scalar_lea.vmem %s1619_s7, 64  ;;  %s1443_s8 = smov [#allocation6]  }
  0x4f   : > { %p1248_p5 = scmp.ne.s32.totalorder %s1619_s7, %s1247_s13  ;;  %s1252_s24 = sshll.u32 %s1443_s8, 4  ;;  %s1253_s24 = int_to_ptr.vmem [resolvable:$false] %s1252_s24 }
  0x50   : > { %s1254_s15 = scalar_lea.vmem %s1253_s24, 128  ;;  %p1255_p11 = scmp.lt.s32.totalorder %s1619_s7, %s1253_s24 }
  0x51   : > { %p1250_p10 = pnand %p1248_p5, %p1858_p7  ;;  %p1256_p2 = scmp.lt.s32.totalorder %s1254_s15, %s1247_s13 }
  0x53   : > { %p1251_p9 = pneg %p1250_p10  ;;  %p1257_p4 = por %p1256_p2, %p1255_p11 }
  0x55   : > { %p1258_p6 = pnand %p1257_p4, %p1251_p9 }
  0x57   : > { %1261 = shalt.err (!%p1258_p6)
}
  0x58   : > { %1125 = dma.hbm_to_vmem [thread:$0]  (!%p1615_p3), %s1611_s10, 64, %s1619_s7, %s1623_s4  }
  0x59   : > { %s1444_s12 = smov [#allocation3]   ;;  %s1445_s20 = smov [#allocation11]  }
  0x5a   : > { %s247_s16 = sshll.u32 %s1444_s12, 4  ;;  %s279_s18 = sshll.u32 %s1445_s20, 4  ;;  %s248_s16 = int_to_ptr.vmem [resolvable:$true] %s247_s16  ;;  %s280_s18 = int_to_ptr.vmem [resolvable:$true] %s279_s18 }
  0x5b   : > { %s1262_s24 = scalar_lea.hbm %s1835_s0, 768 }
  0x5c   : > { %p1263_p11 = scmp.ne.s32.totalorder %s1835_s0, %s1262_s24  ;;  %p1269_p8 = scmp.lt.u32.totalorder %s1262_s24, %s1835_s0 }
  0x5e   : > { %p1265_p9 = pnand %p1263_p11, %p1564_p13 }
  0x60   : > { %p1266_p1 = pneg %p1265_p9 }
  0x62   : > { %p1271_p12 = pnand %p1269_p8, %p1266_p1 }
  0x64   : > { %1274 = shalt.err (!%p1271_p12)
}
  0x65   : > { %s1275_s7 = scalar_lea.vmem %s248_s16, 768  ;;  %p1283_p2 = scmp.lt.s32.totalorder %s248_s16, %s248_s16 }
  0x66   : > { %p1276_p0 = scmp.ne.s32.totalorder %s248_s16, %s1275_s7  ;;  %p1284_p4 = scmp.lt.s32.totalorder %s1275_s7, %s1275_s7 }
  0x68   : > { %p1278_p5 = pnand %p1276_p0, %p1564_p13  ;;  %p1285_p6 = por %p1284_p4, %p1283_p2 }
  0x6a   : > { %p1279_p10 = pneg %p1278_p5 }
  0x6c   : > { %p1286_p7 = pnand %p1285_p6, %p1279_p10 }
  0x6e   : > { %1289 = shalt.err (!%p1286_p7)
}
  0x6f   : > { %p1880_p11 = scmp.ne.s32.totalorder %s1870_s14, 0  ;;  %s1881_s1 = smov 8  }
  0x70   : > { %s1882_s10 = smov 128   ;;  %s1290_s8 = scalar_lea.hbm %s1841_s6, 2048 }
  0x71   : > { %1115 = dma.hbm_to_vmem [thread:$0]  (!%p1880_p11), %s1835_s0, 768, %s248_s16, [#allocation4], %s1882_s10, %s1882_s10, %s1881_s1  }
  0x72   : > { %p1291_p9 = scmp.ne.s32.totalorder %s1841_s6, %s1290_s8  ;;  %p1297_p8 = scmp.lt.u32.totalorder %s1290_s8, %s1841_s6 }
  0x74   : > { %p1293_p7 = pnand %p1291_p9, %p1564_p13 }
  0x76   : > { %p1294_p1 = pneg %p1293_p7 }
  0x78   : > { %p1299_p12 = pnand %p1297_p8, %p1294_p1 }
  0x7a   : > { %1302 = shalt.err (!%p1299_p12)
}
  0x7b   : > { %s1303_s26 = scalar_lea.vmem %s280_s18, 2048  ;;  %p1311_p2 = scmp.lt.s32.totalorder %s280_s18, %s280_s18 }
  0x7c   : > { %p1304_p0 = scmp.ne.s32.totalorder %s280_s18, %s1303_s26  ;;  %p1312_p4 = scmp.lt.s32.totalorder %s1303_s26, %s1303_s26 }
  0x7e   : > { %p1306_p5 = pnand %p1304_p0, %p1564_p13  ;;  %p1313_p6 = por %p1312_p4, %p1311_p2 }
  0x80   : > { %p1307_p10 = pneg %p1306_p5 }
  0x82   : > { %p1314_p3 = pnand %p1313_p6, %p1307_p10 }
  0x84   : > { %1317 = shalt.err (!%p1314_p3)
}
  0x85   : > { %1121 = dma.hbm_to_vmem [thread:$0]  (!%p1880_p11), %s1841_s6, 2048, %s280_s18, [#allocation10], %s1882_s10, %s1882_s10, %s1881_s1  }
  0x86   : > { %s897_s21 = sshll.u32 %s1434_s28, 7  ;;  %s316_s12 = scalar_lea.vmem [#allocation8], %s1621_s19 }
  0x87   : > { %s323_s20 = sshll.u32 %s316_s12, 4  ;;  %s321_s13 = scalar_lea.hbm %s1837_s2, %s897_s21  ;;  %s324_s20 = int_to_ptr.vmem [resolvable:$true] %s323_s20 }
  0x88   : > { %s1318_s15 = scalar_lea.hbm %s321_s13, 128  ;;  %p1883_p3 = scmp.ne.s32.totalorder %s1879_s23, 0 }
  0x89   : > { %p1319_p13 = scmp.ne.s32.totalorder %s321_s13, %s1318_s15  ;;  %s1323_s26 = scalar_lea.hbm %s1837_s2, 256 }
  0x8a   : > { %p1884_p9 = pneg %p1883_p3  ;;  %p1324_p11 = scmp.lt.u32.totalorder %s321_s13, %s1837_s2 }
  0x8b   : > { %p1325_p8 = scmp.lt.u32.totalorder %s1323_s26, %s1318_s15  ;;  %p1327_p0 = scmp.lt.u32.totalorder %s1318_s15, %s321_s13 }
  0x8c   : > { %p1321_p7 = pnand %p1319_p13, %p1884_p9 }
  0x8d   : > { %p1326_p12 = por %p1325_p8, %p1324_p11 }
  0x8e   : > { %p1322_p1 = pneg %p1321_p7 }
  0x8f   : > { %p1328_p5 = por %p1327_p0, %p1326_p12 }
  0x91   : > { %p1329_p10 = pnand %p1328_p5, %p1322_p1 }
  0x93   : > { %1332 = shalt.err (!%p1329_p10)
}
  0x94   : > { %s1333_s19 = scalar_lea.vmem %s324_s20, 128  ;;  %p1885_p4 = pmov %p1884_p9 }
  0x95   : > { %p1334_p2 = scmp.ne.s32.totalorder %s324_s20, %s1333_s19  ;;  %s1446_s1 = smov [#allocation8]  }
  0x96   : > { %s1338_s10 = sshll.u32 %s1446_s1, 4  ;;  %s1339_s10 = int_to_ptr.vmem [resolvable:$false] %s1338_s10 }
  0x97   : > { %p1336_p6 = pnand %p1334_p2, %p1885_p4  ;;  %s1340_s17 = scalar_lea.vmem %s1339_s10, 256 }
  0x98   : > { %p1341_p9 = scmp.lt.s32.totalorder %s324_s20, %s1339_s10  ;;  %p1342_p7 = scmp.lt.s32.totalorder %s1340_s17, %s1333_s19 }
  0x99   : > { %p1337_p13 = pneg %p1336_p6 }
  0x9a   : > { %p1343_p8 = por %p1342_p7, %p1341_p9 }
  0x9c   : > { %p1344_p11 = pnand %p1343_p8, %p1337_p13 }
  0x9e   : > { %1347 = shalt.err (!%p1344_p11)
}
  0x9f   : > { %1128 = dma.hbm_to_vmem [thread:$0]  (!%p1883_p3), %s321_s13, 128, %s324_s20, %s1623_s4  }
  0xa0   : > { %p1886_p1 = scmp.ne.s32.totalorder %s1869_s11, 0 }
  0xa1   : > { %p1887_p12 = scmp.eq.s32.totalorder (!%p1886_p1), %s1523_s30, 0 }
  0xa2   : > { %332 = sbr.rel (%p1886_p1) target bundleno = 1211 (0x4bb), region = 48 }
  0xa9   : > { %1401 = dma.done.wait (%p1887_p12), [#allocation4], 768   ;;  %p1888_p0 = pmov %p1887_p12 }
  0xaa   : > { %s338_s21 = sand.u32 1, %s1523_s30   ;;  %s1721_s12 = sand.u32 1, %s1422_s25  }
  0xab   : > { %1403 = vsyncadd (%p1888_p0), [#allocation4], 4294966528  ;;  %s900_s8 = sshll.u32 %s1721_s12, 2  ;;  %s339_s23 = scalar_lea.sflag [#allocation7], %s338_s21 }
  0xac   : > { %s342_s24 = scalar_lea.vmem [#allocation6], %s900_s8  ;;  %p1889_p3 = scmp.ne.s32.totalorder %s1866_s9, 0 }
  0xae   : > { %1405 = dma.done.wait (%p1889_p3), %s339_s23, 192  }
  0xaf   : > { %1407 = vsyncadd (%p1889_p3), %s339_s23, 4294967104  ;;  %s901_s11 = sshll.u32 %s1721_s12, 3  ;;  %p1890_p5 = pmov %p1888_p0 }
  0xb0   : > { %s1731_s4 = scalar_lea.vmem [#allocation8], %s901_s11 }
  0xb1   : > { %1409 = dma.done.wait (%p1890_p5), [#allocation10], 4096   ;;  %p1891_p10 = pmov %p1888_p0 }
  0xb2   : > { %v1447_v0 = vmov 0.0|0.0   ;;  %vm1448_vm0 = vmmov 0   ;;  %v1449_v1 = vmov 0.0   ;;  %v404_v2 = vld [vmem:[#allocation3] sm:$0xff]  ;;  %v405_v3 = vld [vmem:[#allocation3 + $0x8] sm:$0xff]  ;;  %v406_v4 = vld [vmem:[#allocation3 + $0x10] sm:$0xff]  ;;  %v491_v13 = vlaneseq }
  0xb3   : > { %1411 = vsyncadd (%p1891_p10), [#allocation10], 4294963200  ;;  %1037 = vmatprep.subr.bf16.mxu0 %v1447_v0  ;;  %964 = vmatprep.mubr.msk.f32.mxu0 %vm1448_vm0, %v1449_v1  ;;  %v1038_v5 = vpack.c.bf16 %v405_v3, %v404_v2  ;;  %v407_v6 = vld [vmem:[#allocation3 + $0x18] sm:$0xff]  ;;  %v408_v8 = vld [vmem:[#allocation3 + $0x20] sm:$0xff]  ;;  %vm410_vm1 = vcmask 392192   ;;  %s908_s15 = sshll.u32 %s1430_s27, 7 }
  0xb4   : > { %1046 = vmatprep.subr.bf16.mxu1 %v1447_v0  ;;  %999 = vmatprep.mubr.msk.f32.mxu1 %vm1448_vm0, %v1449_v1  ;;  %v1041_v7 = vpack.c.bf16 %v407_v6, %v406_v4  ;;  %v409_v9 = vld [vmem:[#allocation3 + $0x28] sm:$0xff]  ;;  %v401_v11 = vld [vmem:[%s342_s24] sm:$0xf]  ;;  %v1745_v14 = vshrl.u32 %v491_v13, 7  ;;  %v1751_v16 = vld [vmem:[%s1838_s3] sm:$0xff]  ;;  %v497_v30 = vand.u32 127, %v491_v13 }
  0xb5   : > { %1039 = vmatpush3.bf16.msra.mxu0 %v1038_v5  ;;  %v1044_v10 = vpack.c.bf16 %v409_v9, %v408_v8  ;;  %v402_v12 = vunpack.c.l.bf16 %v401_v11  ;;  %v523_v21 = vld [vmem:[#allocation9] sm:$0xff]  ;;  %v524_v22 = vld [vmem:[#allocation9 + $0x8] sm:$0xff]  ;;  %v525_v23 = vld [vmem:[#allocation9 + $0x10] sm:$0xff]  ;;  %s394_s14 = scalar_lea.vmem [#allocation12], %s901_s11  ;;  %s1892_s18 = sld [smem:[#allocation24_spill]] }
  0xb6   : > { %1040 = vmatprep.subr.bf16.mxu0 %v1447_v0  ;;  %v493_v15 = vsub.s32 0, %v1745_v14  ;;  %v1047_v24 = vpack.c.bf16 %v524_v22, %v523_v21  ;;  %v526_v25 = vld [vmem:[#allocation9 + $0x18] sm:$0xff]  ;;  %v527_v27 = vld [vmem:[#allocation9 + $0x20] sm:$0xff]  ;;  %v528_v28 = vld [vmem:[#allocation9 + $0x28] sm:$0xff]  ;;  %vm498_vm2 = vcmp.lt.s32.totalorder %v497_v30, 32  ;;  %v515_v54 = vsub.s32 1, %v1745_v14 }
  0xb7   : > { %v1050_v26 = vpack.c.bf16 %v526_v25, %v525_v23  ;;  %v1053_v29 = vpack.c.bf16 %v528_v28, %v527_v27  ;;  %v529_v36 = vld [vmem:[#allocation9 + $0x30] sm:$0xff]  ;;  %v530_v37 = vld [vmem:[#allocation9 + $0x38] sm:$0xff]  ;;  %v531_v39 = vld [vmem:[#allocation9 + $0x40] sm:$0xff]  ;;  %v520_v55 = vsub.s32 2, %v1745_v14  ;;  %s755_s7 = sshll.u32 %s394_s14, 4  ;;  %s742_s1 = scalar_lea.sflag [#allocation5], %s1721_s12  ;;  %s1788_s7 = int_to_ptr.vmem [resolvable:$true] %s755_s7 }
  0xb8   : > { %v494_v17 = vrot.slane %v1751_v16, %v493_v15  ;;  %1048 = vmatpush3.bf16.msra.mxu1 %v1047_v24  ;;  %v1056_v38 = vpack.c.bf16 %v530_v37, %v529_v36  ;;  %v532_v40 = vld [vmem:[#allocation9 + $0x48] sm:$0xff]  ;;  %v533_v42 = vld [vmem:[#allocation9 + $0x50] sm:$0xff]  ;;  %v534_v43 = vld [vmem:[#allocation9 + $0x58] sm:$0xff]  ;;  %v516_v56 = vrot.slane %v1751_v16, %v515_v54  ;;  %v661_v54 = vsub.s32 3, %v1745_v14  ;;  %s1348_s10 = scalar_lea.vmem %s1788_s7, 128  ;;  %p1893_p4 = scmp.ne.s32.totalorder %s1876_s22, 0 }
  0xb9   : > { %1042 = vmatpush3.bf16.msra.mxu0 %v1041_v7  ;;  %1049 = vmatprep.subr.bf16.mxu1 %v1447_v0  ;;  %v1059_v41 = vpack.c.bf16 %v532_v40, %v531_v39  ;;  %v1062_v44 = vpack.c.bf16 %v534_v43, %v533_v42  ;;  %v535_v45 = vld [vmem:[#allocation9 + $0x60] sm:$0xff]  ;;  %v536_v46 = vld [vmem:[#allocation9 + $0x68] sm:$0xff]  ;;  %v537_v48 = vld [vmem:[#allocation9 + $0x70] sm:$0xff]  ;;  %v521_v59 = vrot.slane %v1751_v16, %v520_v55  ;;  %v735_v55 = vsub.s32 4, %v1745_v14  ;;  %p1349_p2 = scmp.ne.s32.totalorder %s1788_s7, %s1348_s10  ;;  %s1451_s27 = smov [#allocation12]  }
  0xba   : > { %1043 = vmatprep.subr.bf16.mxu0 %v1447_v0  ;;  %v1065_v47 = vpack.c.bf16 %v536_v46, %v535_v45  ;;  %v538_v49 = vld [vmem:[#allocation9 + $0x78] sm:$0xff]  ;;  %v643_v62 = vld [vmem:[#allocation11] sm:$0xff]  ;;  %v644_v63 = vld [vmem:[#allocation11 + $0x8] sm:$0xff]  ;;  %s1352_s17 = sshll.u32 %s1451_s27, 4  ;;  %s1353_s17 = int_to_ptr.vmem [resolvable:$false] %s1352_s17 }
  0xbb   : > { %v1068_v50 = vpack.c.bf16 %v538_v49, %v537_v48  ;;  %v645_v2 = vld [vmem:[#allocation11 + $0x10] sm:$0xff]  ;;  %v646_v3 = vld [vmem:[#allocation11 + $0x18] sm:$0xff]  ;;  %v647_v5 = vld [vmem:[#allocation11 + $0x20] sm:$0xff]  ;;  %v1450_v48 = vmov -1.0   ;;  %s1786_s19 = scalar_lea.hbm %s1892_s18, %s908_s15  ;;  %p1350_p6 = pnand %p1349_p2, %p1893_p4 }
  0xbc   : > { %1051 = vmatpush3.bf16.msra.mxu1 %v1050_v26  ;;  %v1074_v4 = vpack.c.bf16 %v646_v3, %v645_v2  ;;  %v648_v6 = vld [vmem:[#allocation11 + $0x28] sm:$0xff]  ;;  %v649_v8 = vld [vmem:[#allocation11 + $0x30] sm:$0xff]  ;;  %v650_v9 = vld [vmem:[#allocation11 + $0x38] sm:$0xff]  ;;  %s1354_s21 = scalar_lea.vmem %s1353_s17, 256  ;;  %p1355_p9 = scmp.lt.s32.totalorder %s1788_s7, %s1353_s17 }
  0xbd   : > { %1045 = vmatpush3.bf16.msra.mxu0 %v1044_v10  ;;  %1052 = vmatprep.subr.bf16.mxu1 %v1447_v0  ;;  %v1077_v7 = vpack.c.bf16 %v648_v6, %v647_v5  ;;  %v1080_v10 = vpack.c.bf16 %v650_v9, %v649_v8  ;;  %v651_v11 = vld [vmem:[#allocation11 + $0x40] sm:$0xff]  ;;  %v653_v15 = vld [vmem:[#allocation11 + $0x50] sm:$0xff]  ;;  %v658_v23 = vld [vmem:[#allocation11 + $0x78] sm:$0xff]  ;;  %p1351_p13 = pneg %p1350_p6  ;;  %p1356_p7 = scmp.lt.s32.totalorder %s1354_s21, %s1348_s10 }
  0xbe   : > { %1070 = vmatprep.subr.bf16.mxu0 %v1447_v0  ;;  %v657_v22 = vld [vmem:[#allocation11 + $0x70] sm:$0xff]  ;;  %v906_v25 = vld [vmem:[%s1840_s5] ss:$0 sm:$0xff] }
  0xbf   : > { %v1092_v24 = vpack.c.bf16 %v658_v23, %v657_v22  ;;  %p1357_p8 = por %p1356_p7, %p1355_p9 }
  0xc0   : > { %965 = vmatmul.mubr.msk.f32.vlgmr.msra.gmra.mrb[0].mxu0 %vm410_vm1, %v402_v12  ;;  %1054 = vmatpush3.bf16.msra.mxu1 %v1053_v29  ;;  %v652_v12 = vld [vmem:[#allocation11 + $0x48] sm:$0xff] }
  0xc1   : > { %1034 = vmatprep.mubr.msk.f32.mxu0 %vm1448_vm0, %v1449_v1  ;;  %1055 = vmatprep.subr.bf16.mxu1 %v1447_v0  ;;  %v1071_v1 = vpack.c.bf16 %v644_v63, %v643_v62  ;;  %v1083_v13 = vpack.c.bf16 %v652_v12, %v651_v11  ;;  %p1358_p11 = pnand %p1357_p8, %p1351_p13 }
  0xc3   : > { %1072 = vmatpush3.bf16.msra.mxu0 %v1071_v1 }
  0xc4   : > { %1057 = vmatpush3.bf16.msra.mxu1 %v1056_v38  ;;  %1073 = vmatprep.subr.bf16.mxu0 %v1447_v0 }
  0xc5   : > { %1058 = vmatprep.subr.bf16.mxu1 %v1447_v0 }
  0xc7   : > { %1075 = vmatpush3.bf16.msra.mxu0 %v1074_v4 }
  0xc8   : > { %1060 = vmatpush3.bf16.msra.mxu1 %v1059_v41  ;;  %1076 = vmatprep.subr.bf16.mxu0 %v1447_v0 }
  0xc9   : > { %1061 = vmatprep.subr.bf16.mxu1 %v1447_v0 }
  0xcb   : > { %1078 = vmatpush3.bf16.msra.mxu0 %v1077_v7 }
  0xcc   : > { %1063 = vmatpush3.bf16.msra.mxu1 %v1062_v44  ;;  %1079 = vmatprep.subr.bf16.mxu0 %v1447_v0 }
  0xcd   : > { %1064 = vmatprep.subr.bf16.mxu1 %v1447_v0 }
  0xcf   : > { %1081 = vmatpush3.bf16.msra.mxu0 %v1080_v10 }
  0xd0   : > { %1066 = vmatpush3.bf16.msra.mxu1 %v1065_v47  ;;  %1082 = vmatprep.subr.bf16.mxu0 %v1447_v0 }
  0xd1   : > { %1067 = vmatprep.subr.bf16.mxu1 %v1447_v0 }
  0xd3   : > { %1084 = vmatpush3.bf16.msra.mxu0 %v1083_v13 }
  0xd4   : > { %1069 = vmatpush3.bf16.msra.mxu1 %v1068_v50  ;;  %1085 = vmatprep.subr.bf16.mxu0 %v1447_v0 }
 0x193   : > { %v480_v18 = vpop.f32.mrb[0].mxu0 }
 0x194   : > { %v495_v19 = vadd.f32 %v494_v17, %v480_v18  ;;  %v966_v20 = vpop.f32.mrb[1].mxu0  ;;  %v654_v17 = vld [vmem:[#allocation11 + $0x58] sm:$0xff] }
 0x195   : > { %v1086_v18 = vpack.c.bf16 %v654_v17, %v653_v15  ;;  %v656_v20 = vld [vmem:[#allocation11 + $0x68] sm:$0xff] }
 0x196   : > { %499 = vadd.xlane.f32.xlu0 %v495_v19 }
 0x197   : > { %1087 = vmatpush3.bf16.msra.mxu0 %v1086_v18 }
 0x198   : > { %1088 = vmatprep.subr.bf16.mxu0 %v1447_v0 }
 0x223   : > { %v500_v31 = vpop.xlane.xlu0 %499 }
 0x224   : > { %v501_v32 = vmul.f32 0.03125, %v500_v31 }
 0x226   : > { %v502_v33 = vsub.f32 %v495_v19, %v501_v32  ;;  %v655_v19 = vld [vmem:[#allocation11 + $0x60] sm:$0xff] }
 0x227   : > { %v1089_v21 = vpack.c.bf16 %v656_v20, %v655_v19 }
 0x228   : > { %v505_v34 = vsel %vm498_vm2, %v502_v33, 0.0 }
 0x229   : > { %v506_v35 = vmul.f32 %v505_v34, %v505_v34  ;;  %1090 = vmatpush3.bf16.msra.mxu0 %v1089_v21 }
 0x22a   : > { %1091 = vmatprep.subr.bf16.mxu0 %v1447_v0 }
 0x22b   : > { %507 = vadd.xlane.f32.xlu0 %v506_v35 }
 0x22d   : > { %1093 = vmatpush3.bf16.msra.mxu0 %v1092_v24 }
 0x2b8   : > { %v508_v51 = vpop.xlane.xlu0 %507 }
 0x2b9   : > { %v509_v52 = vmul.f32 0.03125, %v508_v51 }
 0x2bb   : > { %v510_v53 = vadd.f32 1e-05, %v509_v52 }
 0x2bd   : > { %1198 = vrsqrt.f32 %v510_v53 }
 0x2c7   : > { %v1199_v57 = vpop.eup %1198 }
 0x2c8   : > { %v512_v58 = vmul.f32 %v1199_v57, %v505_v34  ;;  %v736_v57 = vrot.slane %v1751_v16, %v735_v55 }
 0x2ca   : > { %v517_v60 = vmul.f32 %v516_v56, %v512_v58  ;;  %v662_v56 = vrot.slane %v1751_v16, %v661_v54 }
 0x2cc   : > { %v522_v61 = vadd.f32 %v521_v59, %v517_v60 }
 0x2ce   : > { %1000 = vmatmul.mubr.f32.vlgmr.msra.gmra.mrb[0].mxu1 %v522_v61  ;;  %v738_v61 = vld [vmem:[%s1731_s4] sm:$0xff] }
 0x3a1   : > { %v612_v26 = vpop.f32.mrb[0].mxu1 }
 0x3a2   : > { %v613_v27 = vadd.f32 %v906_v25, %v612_v26  ;;  %v1001_v28 = vpop.f32.mrb[1].mxu1 }
 0x3a4   : > { %v616_v29 = vmul.f32 0.70710677, %v613_v27  ;;  %v640_v51 = vmul.f32 0.5, %v613_v27 }
 0x3a6   : > { %v619_v30 = vand.u32 2147483647, %v616_v29  ;;  %vm617_vm3 = vcmp.ge.f32.partialorder %v616_v29, 0.0 }
 0x3a7   : > { %v618_v49 = vsel %vm617_vm3, 1.0, %v1450_v48 }
 0x3a8   : > { %v620_v31 = vmul.f32 0.3275911, %v619_v30  ;;  %v633_v33 = vsub.f32 0.0, %v619_v30 }
 0x3aa   : > { %v621_v32 = vadd.f32 1.0, %v620_v31  ;;  %v634_v35 = vmul.f32 %v633_v33, %v619_v30 }
 0x3ac   : > { %1200 = vrcp.f32 %v621_v32  ;;  %v635_v37 = vmul.f32 1.442695, %v634_v35 }
 0x3ae   : > { %1202 = vpow2.f32 %v635_v37 }
 0x3b6   : > { %v1201_v34 = vpop.eup %1200 }
 0x3b7   : > { %v624_v0 = vmul.f32 1.0614054, %v1201_v34 }
 0x3b8   : > { %v1203_v45 = vpop.eup %1202 }
 0x3b9   : > { %v625_v36 = vadd.f32 -1.4531521, %v624_v0 }
 0x3bb   : > { %v626_v38 = vmul.f32 %v1201_v34, %v625_v36 }
 0x3bd   : > { %v627_v39 = vadd.f32 1.4214138, %v626_v38 }
 0x3bf   : > { %v628_v40 = vmul.f32 %v1201_v34, %v627_v39 }
 0x3c1   : > { %v629_v41 = vadd.f32 -0.28449672, %v628_v40 }
 0x3c3   : > { %v630_v42 = vmul.f32 %v1201_v34, %v629_v41 }
 0x3c5   : > { %v631_v43 = vadd.f32 0.2548296, %v630_v42 }
 0x3c7   : > { %v632_v44 = vmul.f32 %v1201_v34, %v631_v43 }
 0x3c9   : > { %v637_v46 = vmul.f32 %v1203_v45, %v632_v44 }
 0x3cb   : > { %v638_v47 = vsub.f32 1.0, %v637_v46 }
 0x3cd   : > { %v639_v50 = vmul.f32 %v638_v47, %v618_v49 }
 0x3cf   : > { %v641_v52 = vadd.f32 1.0, %v639_v50 }
 0x3d1   : > { %v642_v53 = vmul.f32 %v641_v52, %v640_v51 }
 0x3d3   : > { %1035 = vmatmul.mubr.f32.vlgmr.msra.gmra.mrb[2].mxu0 %v642_v53 }
 0x4a6   : > { %v729_v58 = vpop.f32.mrb[2].mxu0 }
 0x4a7   : > { %v730_v59 = vadd.f32 %v729_v58, %v662_v56  ;;  %v1036_v60 = vpop.f32.mrb[3].mxu0 }
 0x4a9   : > { %v737_v62 = vmul.f32 %v736_v57, %v730_v59 }
 0x4ab   : > { %v739_v63 = vadd.f32 %v738_v61, %v737_v62 }
 0x4ad   : > { %740 = vst [vmem:[%s394_s14] sm:$0xff] %v739_v63 }
 0x4ae   : > { %1361 = shalt.err (!%p1358_p11)
}
 0x4af   : > { %s1362_s12 = scalar_lea.hbm %s1786_s19, 128  ;;  %s1366_s24 = scalar_lea.hbm %s1892_s18, 256 }
 0x4b0   : > { %p1363_p1 = scmp.ne.s32.totalorder %s1786_s19, %s1362_s12  ;;  %p1367_p3 = scmp.lt.u32.totalorder %s1786_s19, %s1892_s18 }
 0x4b1   : > { %p1368_p5 = scmp.lt.u32.totalorder %s1366_s24, %s1362_s12  ;;  %p1370_p2 = scmp.lt.u32.totalorder %s1362_s12, %s1786_s19 }
 0x4b2   : > { %p1364_p12 = pnand %p1363_p1, %p1893_p4 }
 0x4b3   : > { %p1369_p10 = por %p1368_p5, %p1367_p3 }
 0x4b4   : > { %p1365_p0 = pneg %p1364_p12 }
 0x4b5   : > { %p1371_p6 = por %p1370_p2, %p1369_p10 }
 0x4b7   : > { %p1372_p13 = pnand %p1371_p6, %p1365_p0 }
 0x4b9   : > { %1375 = shalt.err (!%p1372_p13)
}
 0x4ba   : > { %1110 = dma.vmem_to_hbm [thread:$0]  (%p1893_p4), %s1788_s7, 128, %s1786_s19, %s742_s1  }
 0x4bb PF: > { %s1894_s30 = sld [smem:[#allocation17_spill]]  ;;  %s1895_s9 = sld [smem:[#allocation19_spill]] }
 0x4bc   : > { %p1897_p7 = scmp.ge.s32.totalorder %s1438_s29, 2 }
 0x4c1   : > { %s767_s20 = sand.u32 1, %s1894_s30   ;;  %p1896_p9 = scmp.ne.s32.totalorder %s1895_s9, 0 }
 0x4c2   : > { %s768_s13 = scalar_lea.sflag [#allocation5], %s767_s20 }
 0x4c3   : > { %p1130_p8 = pnand %p1897_p7, %p1896_p9 }
 0x4c5   : > { %1413 = dma.done.wait (!%p1130_p8), %s768_s13, 128  }
 0x4c6   : > { %1415 = vsyncadd (!%p1130_p8), %s768_s13, 4294967168  ;;  %s25_s29 = sadd.s32 1, %s1438_s29   ;;  %s1898_s15 = sld [smem:[#allocation18_spill]] }
 0x4c7   : > { %p22_p11 = scmp.ge.s32.totalorder %s25_s29, 4   ;;  %s1899_s26 = sld [smem:[#allocation21_spill]] }
 0x4c8   : > { %s1900_s22 = sld [smem:[#allocation20_spill]]  ;;  %s1901_s24 = smov %s1422_s25 }
 0x4c9   : > { %s1903_s27 = smov %s1434_s28  ;;  %24 = sbr.rel (!%p22_p11) target bundleno = 12 (0xc), region = 126 }
 0x4cc   : > { %s1902_s25 = smov %s1898_s15 }
 0x4ce   : > { %s1904_s28 = smov %s1900_s22 }
 0x4d0   :  { %773 = vsyncpa [#allocation4], 1 }
 0x4d1   :  { %775 = vsyncpa [#allocation4 + $0x1], 1 }
 0x4d2   :  { %776 = vsyncpa [#allocation7], 1 }
 0x4d3   :  { %778 = vsyncpa [#allocation7 + $0x1], 1 }
 0x4d4   :  { %779 = vsyncpa [#allocation10], 1 }
 0x4d5   :  { %780 = vsyncpa [#allocation5], 1 }
 0x4d6   :  { %782 = vsyncpa [#allocation5 + $0x1], 1 }

</bundles_post_ra>
